<compile_context>
chip_gen: v7x
topology: tpu7x:2x2x1
jax: 0.10.0
libtpu: 0.0.40
codegen_flags: <defaults>
</compile_context>

<pallas_src>
import math
import functools

import jax
import jax.numpy as jnp
from jax.experimental import pallas as pl
from jax.experimental.pallas import tpu as pltpu


def _mha_kernel(x_ref, wqkv_ref, wo_ref, o_ref, ctx_ref, *, num_heads, head_dim):
    # One grid step == one batch element; everything lives in VMEM (small shapes).
    c = num_heads * head_dim
    x = x_ref[0]                                                        # (S, C) f32

    # Fused Q/K/V projection: single matmul against the (C, 3C) slab.
    # The attention scale is already folded into the Q columns (wrapper side).
    qkv = jnp.dot(x, wqkv_ref[...], preferred_element_type=jnp.float32)  # (S, 3C)
    q = qkv[:, 0 * c:1 * c]
    k = qkv[:, 1 * c:2 * c]
    v = qkv[:, 2 * c:3 * c]

    # Per-head attention (num_heads is small & static -> unrolled).  Each head's
    # context is stored straight into the scratch slab: no lane-dim concatenate.
    for h in range(num_heads):
        sl = slice(h * head_dim, (h + 1) * head_dim)
        qh, kh, vh = q[:, sl], k[:, sl], v[:, sl]                       # (S, D)
        # scores = qh @ kh^T, contracting last dims (no materialized transpose).
        scores = jax.lax.dot_general(
            qh, kh,
            dimension_numbers=(((1,), (1,)), ((), ())),
            preferred_element_type=jnp.float32)                         # (S, S)
        # Numerically-stable softmax along the last axis.
        scores = scores - jnp.max(scores, axis=-1, keepdims=True)
        p = jnp.exp(scores)
        p = p * pl.reciprocal(jnp.sum(p, axis=-1, keepdims=True), approx=True)
        ctx_ref[:, sl] = jnp.dot(p, vh, preferred_element_type=jnp.float32)

    # Output projection from the assembled (S, C) context slab.
    out = jnp.dot(ctx_ref[...], wo_ref[...], preferred_element_type=jnp.float32)
    o_ref[0] = out.astype(o_ref.dtype)


def multi_head_attention(x, wq, wk, wv, wo, *, num_heads):
    """x: (N, S, C) float32.  wq/wk/wv/wo: (out, in) PyTorch-layout weights."""
    n, s, c = x.shape
    assert c % num_heads == 0
    head_dim = c // num_heads
    scale = 1.0 / math.sqrt(head_dim)

    # Pre-transpose weights to (in, out), fold the attention scale into Q, and
    # fuse Q/K/V into one (C, 3C) slab so the kernel does a single projection.
    wqkv = jnp.concatenate([wq.T * scale, wk.T, wv.T], axis=1)   # (C, 3C)
    wo_t = wo.T                                                  # (C, C)

    kernel = functools.partial(_mha_kernel, num_heads=num_heads, head_dim=head_dim)

    return pl.pallas_call(
        kernel,
        out_shape=jax.ShapeDtypeStruct((n, s, c), x.dtype),
        grid_spec=pltpu.PrefetchScalarGridSpec(
            num_scalar_prefetch=0,
            grid=(n,),
            in_specs=[
                pl.BlockSpec((1, s, c), lambda b: (b, 0, 0)),      # x, one batch/step
                pl.BlockSpec((c, 3 * c), lambda b: (0, 0)),        # fused Wqkv
                pl.BlockSpec((c, c), lambda b: (0, 0)),            # Wo
            ],
            out_specs=pl.BlockSpec((1, s, c), lambda b: (b, 0, 0)),
            scratch_shapes=[pltpu.VMEM((s, c), jnp.float32)],      # context slab
        ),
        compiler_params=pltpu.CompilerParams(
            dimension_semantics=("parallel",),   # megacore: 1 batch per TC on v7x
        ),
    )(x, wqkv, wo_t)


def _reference(x, wq, wk, wv, wo, *, num_heads):
    """Pure-JAX replica of the PyTorch forward, for correctness checking."""
    n, hw, c = x.shape
    d = c // num_heads
    q = (x @ wq.T).reshape(n, hw, num_heads, d).transpose(0, 2, 1, 3)
    k = (x @ wk.T).reshape(n, hw, num_heads, d).transpose(0, 2, 1, 3)
    v = (x @ wv.T).reshape(n, hw, num_heads, d).transpose(0, 2, 1, 3)
    attn = jnp.einsum("nhqd,nhkd->nhqk", q, k) / math.sqrt(d)
    attn = jax.nn.softmax(attn, axis=-1)
    out = jnp.einsum("nhqk,nhkd->nhqd", attn, v).transpose(0, 2, 1, 3).reshape(n, hw, c)
    return out @ wo.T


if __name__ == "__main__":
    # Small shapes consistent with the module: batch=2, seq(hw)=16, embed_dim=32, heads=4.
    N, S, C, H = 2, 16, 32, 4

    key = jax.random.PRNGKey(0)
    kx, kq, kk, kv, ko = jax.random.split(key, 5)

    # Deterministic parameter init (PyTorch Linear default: U(-1/sqrt(in), 1/sqrt(in))).
    bound = 1.0 / math.sqrt(C)
    x = jax.random.normal(kx, (N, S, C), dtype=jnp.float32)
    wq = jax.random.uniform(kq, (C, C), jnp.float32, -bound, bound)
    wk = jax.random.uniform(kk, (C, C), jnp.float32, -bound, bound)
    wv = jax.random.uniform(kv, (C, C), jnp.float32, -bound, bound)
    wo = jax.random.uniform(ko, (C, C), jnp.float32, -bound, bound)

    out = multi_head_attention(x, wq, wk, wv, wo, num_heads=H)
    out = jax.block_until_ready(out)

    ref = _reference(x, wq, wk, wv, wo, num_heads=H)
    assert out.shape == (N, S, C)
    # Tolerance leaves headroom for the EUP approximate-reciprocal softmax denom.
    assert jnp.allclose(out, ref, atol=2e-3, rtol=2e-3), "mismatch vs reference"

    print("KERNEL_OK")
</pallas_src>

<mosaic_0001>
module attributes {stable_mosaic.version = 11 : i64} {
  func.func @_mha_kernel(%arg0: i32, %arg1: memref<1x16x32xf32, #tpu.memory_space<vmem>>, %arg2: memref<32x96xf32, #tpu.memory_space<vmem>>, %arg3: memref<32x32xf32, #tpu.memory_space<vmem>>, %arg4: memref<1x16x32xf32, #tpu.memory_space<vmem>>, %arg5: memref<16x32xf32, #tpu.memory_space<vmem>>) attributes {dimension_semantics = [#tpu.dimension_semantics<parallel>], iteration_bounds = array<i64: 2>, scalar_prefetch = 0 : i64, scratch_operands = 1 : i64, tpu.core_type = #tpu.core_type<tc>, window_params = [{transform_indices = @transform_0, window_bounds = array<i64: 1, 16, 32>}, {pipeline_mode = #tpu.pipeline_mode<synchronous>, transform_indices = @transform_1, window_bounds = array<i64: 32, 96>}, {pipeline_mode = #tpu.pipeline_mode<synchronous>, transform_indices = @transform_2, window_bounds = array<i64: 32, 32>}, {transform_indices = @transform_3, window_bounds = array<i64: 1, 16, 32>}]} {
    %c0 = arith.constant 0 : index
    %c0_0 = arith.constant 0 : index
    %c0_1 = arith.constant 0 : index
    %0 = vector.load %arg1[%c0, %c0_0, %c0_1] : memref<1x16x32xf32, #tpu.memory_space<vmem>>, vector<1x16x32xf32>
    %1 = vector.shape_cast %0 : vector<1x16x32xf32> to vector<16x32xf32>
    %c0_2 = arith.constant 0 : index
    %c0_3 = arith.constant 0 : index
    %2 = vector.load %arg2[%c0_2, %c0_3] : memref<32x96xf32, #tpu.memory_space<vmem>>, vector<32x96xf32>
    %cst = arith.constant dense<0.000000e+00> : vector<16x96xf32>
    %3 = tpu.matmul %1, %2, %cst {dimension_numbers = #tpu.dot_dimension_numbers<[1], [0], [0], [1], [0, 0, 1, 1], [], []>} : vector<16x32xf32>, vector<32x96xf32>, vector<16x96xf32> -> vector<16x96xf32>
    %4 = vector.extract_strided_slice %3 {offsets = [0, 0], sizes = [16, 32], strides = [1, 1]} : vector<16x96xf32> to vector<16x32xf32>
    %5 = vector.extract_strided_slice %3 {offsets = [0, 32], sizes = [16, 32], strides = [1, 1]} : vector<16x96xf32> to vector<16x32xf32>
    %6 = vector.extract_strided_slice %3 {offsets = [0, 64], sizes = [16, 32], strides = [1, 1]} : vector<16x96xf32> to vector<16x32xf32>
    %7 = vector.extract_strided_slice %4 {offsets = [0, 0], sizes = [16, 8], strides = [1, 1]} : vector<16x32xf32> to vector<16x8xf32>
    %8 = vector.extract_strided_slice %5 {offsets = [0, 0], sizes = [16, 8], strides = [1, 1]} : vector<16x32xf32> to vector<16x8xf32>
    %9 = vector.extract_strided_slice %6 {offsets = [0, 0], sizes = [16, 8], strides = [1, 1]} : vector<16x32xf32> to vector<16x8xf32>
    %cst_4 = arith.constant dense<0.000000e+00> : vector<16x16xf32>
    %10 = tpu.matmul %7, %8, %cst_4 {dimension_numbers = #tpu.dot_dimension_numbers<[1], [1], [0], [0], [0, 0, 1, 0], [], []>} : vector<16x8xf32>, vector<16x8xf32>, vector<16x16xf32> -> vector<16x16xf32>
    %cst_5 = arith.constant dense<0xFF800000> : vector<16xf32>
    %11 = vector.multi_reduction <maximumf>, %10, %cst_5 [1] : vector<16x16xf32> to vector<16xf32>
    %12 = vector.shape_cast %11 : vector<16xf32> to vector<16x1xf32>
    %13 = vector.broadcast %12 : vector<16x1xf32> to vector<16x16xf32>
    %14 = arith.subf %10, %13 : vector<16x16xf32>
    %15 = math.exp %14 : vector<16x16xf32>
    %cst_6 = arith.constant dense<0.000000e+00> : vector<16xf32>
    %16 = vector.multi_reduction <add>, %15, %cst_6 [1] : vector<16x16xf32> to vector<16xf32>
    %17 = vector.shape_cast %16 : vector<16xf32> to vector<16x1xf32>
    %18 = tpu.reciprocal %17 {approx = true} : vector<16x1xf32> -> vector<16x1xf32>
    %19 = vector.broadcast %18 : vector<16x1xf32> to vector<16x16xf32>
    %20 = arith.mulf %15, %19 : vector<16x16xf32>
    %cst_7 = arith.constant dense<0.000000e+00> : vector<16x8xf32>
    %21 = tpu.matmul %20, %9, %cst_7 {dimension_numbers = #tpu.dot_dimension_numbers<[1], [0], [0], [1], [0, 0, 1, 1], [], []>} : vector<16x16xf32>, vector<16x8xf32>, vector<16x8xf32> -> vector<16x8xf32>
    %c0_8 = arith.constant 0 : index
    %c0_9 = arith.constant 0 : index
    %22 = vector.load %arg5[%c0_8, %c0_9] : memref<16x32xf32, #tpu.memory_space<vmem>>, vector<16x8xf32>
    tpu.vector_store %arg5[%c0_8, %c0_9], %21 {strides = array<i32>} : memref<16x32xf32, #tpu.memory_space<vmem>>, vector<16x8xf32>,
    %23 = vector.extract_strided_slice %4 {offsets = [0, 8], sizes = [16, 8], strides = [1, 1]} : vector<16x32xf32> to vector<16x8xf32>
    %24 = vector.extract_strided_slice %5 {offsets = [0, 8], sizes = [16, 8], strides = [1, 1]} : vector<16x32xf32> to vector<16x8xf32>
    %25 = vector.extract_strided_slice %6 {offsets = [0, 8], sizes = [16, 8], strides = [1, 1]} : vector<16x32xf32> to vector<16x8xf32>
    %cst_10 = arith.constant dense<0.000000e+00> : vector<16x16xf32>
    %26 = tpu.matmul %23, %24, %cst_10 {dimension_numbers = #tpu.dot_dimension_numbers<[1], [1], [0], [0], [0, 0, 1, 0], [], []>} : vector<16x8xf32>, vector<16x8xf32>, vector<16x16xf32> -> vector<16x16xf32>
    %cst_11 = arith.constant dense<0xFF800000> : vector<16xf32>
    %27 = vector.multi_reduction <maximumf>, %26, %cst_11 [1] : vector<16x16xf32> to vector<16xf32>
    %28 = vector.shape_cast %27 : vector<16xf32> to vector<16x1xf32>
    %29 = vector.broadcast %28 : vector<16x1xf32> to vector<16x16xf32>
    %30 = arith.subf %26, %29 : vector<16x16xf32>
    %31 = math.exp %30 : vector<16x16xf32>
    %cst_12 = arith.constant dense<0.000000e+00> : vector<16xf32>
    %32 = vector.multi_reduction <add>, %31, %cst_12 [1] : vector<16x16xf32> to vector<16xf32>
    %33 = vector.shape_cast %32 : vector<16xf32> to vector<16x1xf32>
    %34 = tpu.reciprocal %33 {approx = true} : vector<16x1xf32> -> vector<16x1xf32>
    %35 = vector.broadcast %34 : vector<16x1xf32> to vector<16x16xf32>
    %36 = arith.mulf %31, %35 : vector<16x16xf32>
    %cst_13 = arith.constant dense<0.000000e+00> : vector<16x8xf32>
    %37 = tpu.matmul %36, %25, %cst_13 {dimension_numbers = #tpu.dot_dimension_numbers<[1], [0], [0], [1], [0, 0, 1, 1], [], []>} : vector<16x16xf32>, vector<16x8xf32>, vector<16x8xf32> -> vector<16x8xf32>
    %c0_14 = arith.constant 0 : index
    %c8 = arith.constant 8 : index
    %38 = vector.load %arg5[%c0_14, %c8] : memref<16x32xf32, #tpu.memory_space<vmem>>, vector<16x8xf32>
    tpu.vector_store %arg5[%c0_14, %c8], %37 {strides = array<i32>} : memref<16x32xf32, #tpu.memory_space<vmem>>, vector<16x8xf32>,
    %39 = vector.extract_strided_slice %4 {offsets = [0, 16], sizes = [16, 8], strides = [1, 1]} : vector<16x32xf32> to vector<16x8xf32>
    %40 = vector.extract_strided_slice %5 {offsets = [0, 16], sizes = [16, 8], strides = [1, 1]} : vector<16x32xf32> to vector<16x8xf32>
    %41 = vector.extract_strided_slice %6 {offsets = [0, 16], sizes = [16, 8], strides = [1, 1]} : vector<16x32xf32> to vector<16x8xf32>
    %cst_15 = arith.constant dense<0.000000e+00> : vector<16x16xf32>
    %42 = tpu.matmul %39, %40, %cst_15 {dimension_numbers = #tpu.dot_dimension_numbers<[1], [1], [0], [0], [0, 0, 1, 0], [], []>} : vector<16x8xf32>, vector<16x8xf32>, vector<16x16xf32> -> vector<16x16xf32>
    %cst_16 = arith.constant dense<0xFF800000> : vector<16xf32>
    %43 = vector.multi_reduction <maximumf>, %42, %cst_16 [1] : vector<16x16xf32> to vector<16xf32>
    %44 = vector.shape_cast %43 : vector<16xf32> to vector<16x1xf32>
    %45 = vector.broadcast %44 : vector<16x1xf32> to vector<16x16xf32>
    %46 = arith.subf %42, %45 : vector<16x16xf32>
    %47 = math.exp %46 : vector<16x16xf32>
    %cst_17 = arith.constant dense<0.000000e+00> : vector<16xf32>
    %48 = vector.multi_reduction <add>, %47, %cst_17 [1] : vector<16x16xf32> to vector<16xf32>
    %49 = vector.shape_cast %48 : vector<16xf32> to vector<16x1xf32>
    %50 = tpu.reciprocal %49 {approx = true} : vector<16x1xf32> -> vector<16x1xf32>
    %51 = vector.broadcast %50 : vector<16x1xf32> to vector<16x16xf32>
    %52 = arith.mulf %47, %51 : vector<16x16xf32>
    %cst_18 = arith.constant dense<0.000000e+00> : vector<16x8xf32>
    %53 = tpu.matmul %52, %41, %cst_18 {dimension_numbers = #tpu.dot_dimension_numbers<[1], [0], [0], [1], [0, 0, 1, 1], [], []>} : vector<16x16xf32>, vector<16x8xf32>, vector<16x8xf32> -> vector<16x8xf32>
    %c0_19 = arith.constant 0 : index
    %c16 = arith.constant 16 : index
    %54 = vector.load %arg5[%c0_19, %c16] : memref<16x32xf32, #tpu.memory_space<vmem>>, vector<16x8xf32>
    tpu.vector_store %arg5[%c0_19, %c16], %53 {strides = array<i32>} : memref<16x32xf32, #tpu.memory_space<vmem>>, vector<16x8xf32>,
    %55 = vector.extract_strided_slice %4 {offsets = [0, 24], sizes = [16, 8], strides = [1, 1]} : vector<16x32xf32> to vector<16x8xf32>
    %56 = vector.extract_strided_slice %5 {offsets = [0, 24], sizes = [16, 8], strides = [1, 1]} : vector<16x32xf32> to vector<16x8xf32>
    %57 = vector.extract_strided_slice %6 {offsets = [0, 24], sizes = [16, 8], strides = [1, 1]} : vector<16x32xf32> to vector<16x8xf32>
    %cst_20 = arith.constant dense<0.000000e+00> : vector<16x16xf32>
    %58 = tpu.matmul %55, %56, %cst_20 {dimension_numbers = #tpu.dot_dimension_numbers<[1], [1], [0], [0], [0, 0, 1, 0], [], []>} : vector<16x8xf32>, vector<16x8xf32>, vector<16x16xf32> -> vector<16x16xf32>
    %cst_21 = arith.constant dense<0xFF800000> : vector<16xf32>
    %59 = vector.multi_reduction <maximumf>, %58, %cst_21 [1] : vector<16x16xf32> to vector<16xf32>
    %60 = vector.shape_cast %59 : vector<16xf32> to vector<16x1xf32>
    %61 = vector.broadcast %60 : vector<16x1xf32> to vector<16x16xf32>
    %62 = arith.subf %58, %61 : vector<16x16xf32>
    %63 = math.exp %62 : vector<16x16xf32>
    %cst_22 = arith.constant dense<0.000000e+00> : vector<16xf32>
    %64 = vector.multi_reduction <add>, %63, %cst_22 [1] : vector<16x16xf32> to vector<16xf32>
    %65 = vector.shape_cast %64 : vector<16xf32> to vector<16x1xf32>
    %66 = tpu.reciprocal %65 {approx = true} : vector<16x1xf32> -> vector<16x1xf32>
    %67 = vector.broadcast %66 : vector<16x1xf32> to vector<16x16xf32>
    %68 = arith.mulf %63, %67 : vector<16x16xf32>
    %cst_23 = arith.constant dense<0.000000e+00> : vector<16x8xf32>
    %69 = tpu.matmul %68, %57, %cst_23 {dimension_numbers = #tpu.dot_dimension_numbers<[1], [0], [0], [1], [0, 0, 1, 1], [], []>} : vector<16x16xf32>, vector<16x8xf32>, vector<16x8xf32> -> vector<16x8xf32>
    %c0_24 = arith.constant 0 : index
    %c24 = arith.constant 24 : index
    %70 = vector.load %arg5[%c0_24, %c24] : memref<16x32xf32, #tpu.memory_space<vmem>>, vector<16x8xf32>
    tpu.vector_store %arg5[%c0_24, %c24], %69 {strides = array<i32>} : memref<16x32xf32, #tpu.memory_space<vmem>>, vector<16x8xf32>,
    %c0_25 = arith.constant 0 : index
    %c0_26 = arith.constant 0 : index
    %71 = vector.load %arg5[%c0_25, %c0_26] : memref<16x32xf32, #tpu.memory_space<vmem>>, vector<16x32xf32>
    %c0_27 = arith.constant 0 : index
    %c0_28 = arith.constant 0 : index
    %72 = vector.load %arg3[%c0_27, %c0_28] : memref<32x32xf32, #tpu.memory_space<vmem>>, vector<32x32xf32>
    %cst_29 = arith.constant dense<0.000000e+00> : vector<16x32xf32>
    %73 = tpu.matmul %71, %72, %cst_29 {dimension_numbers = #tpu.dot_dimension_numbers<[1], [0], [0], [1], [0, 0, 1, 1], [], []>} : vector<16x32xf32>, vector<32x32xf32>, vector<16x32xf32> -> vector<16x32xf32>
    %c0_30 = arith.constant 0 : index
    %c0_31 = arith.constant 0 : index
    %c0_32 = arith.constant 0 : index
    %74 = vector.load %arg4[%c0_30, %c0_31, %c0_32] : memref<1x16x32xf32, #tpu.memory_space<vmem>>, vector<1x16x32xf32>
    %75 = vector.shape_cast %74 : vector<1x16x32xf32> to vector<16x32xf32>
    %76 = vector.shape_cast %73 : vector<16x32xf32> to vector<1x16x32xf32>
    tpu.vector_store %arg4[%c0_30, %c0_31, %c0_32], %76 {strides = array<i32>} : memref<1x16x32xf32, #tpu.memory_space<vmem>>, vector<1x16x32xf32>,
    return
  }
  func.func @transform_0(%arg0: i32) -> (i32, i32, i32) {
    %c0_i32 = arith.constant 0 : i32
    %c0_i32_0 = arith.constant 0 : i32
    %c0_i32_1 = arith.constant 0 : i32
    return %arg0, %c0_i32, %c0_i32_0 : i32, i32, i32
  }
  func.func @transform_1(%arg0: i32) -> (i32, i32) {
    %c0_i32 = arith.constant 0 : i32
    %c0_i32_0 = arith.constant 0 : i32
    %c0_i32_1 = arith.constant 0 : i32
    return %c0_i32, %c0_i32_0 : i32, i32
  }
  func.func @transform_2(%arg0: i32) -> (i32, i32) {
    %c0_i32 = arith.constant 0 : i32
    %c0_i32_0 = arith.constant 0 : i32
    %c0_i32_1 = arith.constant 0 : i32
    return %c0_i32, %c0_i32_0 : i32, i32
  }
  func.func @transform_3(%arg0: i32) -> (i32, i32, i32) {
    %c0_i32 = arith.constant 0 : i32
    %c0_i32_0 = arith.constant 0 : i32
    %c0_i32_1 = arith.constant 0 : i32
    return %arg0, %c0_i32, %c0_i32_0 : i32, i32, i32
  }
}

</mosaic_0001>

<bundles_post_ra>
// kernel: tpu_custom_call.1
= control target key start
LH: loop header
LB: loop body
LE: loop exit
PB: predicated region body
PF: predicated region fallthrough
CT: control target
= control target key end

     0   :  { %8 = vsyncpa [#allocation4], 0  ;;  %s2259_s0 = inlined_call_operand.hbm [shape: f32[2,16,32], index: 0, kind: input, shape index: {}]   ;;  %s2260_s1 = inlined_call_operand.hbm [shape: f32[32,96], index: 1, kind: input, shape index: {}]   ;;  %s2261_s2 = inlined_call_operand.hbm [shape: f32[32,32], index: 2, kind: input, shape index: {}]   ;;  %s2262_s3 = inlined_call_operand.hbm [shape: f32[2,16,32], index: 3, kind: output, shape index: {}]  }
   0x1   :  { %10 = vsyncpa [#allocation4 + $0x1], 0 }
   0x2   :  { %11 = vsyncpa [#allocation7], 0 }
   0x3   :  { %12 = vsyncpa [#allocation5], 0 }
   0x4   :  { %14 = vsyncpa [#allocation5 + $0x1], 0  ;;  %s1917_s12 = smov 0   ;;  %s1919_s13 = smov 0  }
   0x5   :  { %s1921_s14 = smov 0   ;;  %s1923_s15 = smov 0  }
   0x6 LB: > { %s1938_s16 = sadd.s32 4294967295, %s1874_s15   ;;  %s1336_s17 = sadd.s32 4294967294, %s1874_s15   ;;  %s1874_s15 = sphi %s1923_s15, %s2284_s15   ;;  %s1870_s14 = sphi %s1921_s14, %s2283_s14   ;;  %s1866_s13 = sphi %s1919_s13, %s2282_s13   ;;  %s1862_s12 = sphi %s1917_s12, %s2281_s12  }
   0x7   : > { %p40_p0 = scmp.ne.s32.totalorder %s1866_s13, %s1862_s12  ;;  %p2263_p1 = scmp.eq.s32.totalorder %s1938_s16, 0 }
   0x8   : > { %p112_p3 = scmp.eq.s32.totalorder %s1336_s17, 1  ;;  %p1337_p5 = scmp.ge.s32.totalorder %s1874_s15, 1 }
   0x9   : > { %p1947_p4 = por %p2263_p1, %p40_p0  ;;  %p119_p7 = scmp.lt.s32.totalorder %s1874_s15, 3 }
   0xa   : > { %p1952_p6 = por %p112_p3, %p40_p0  ;;  %s1876_s21 = smov [#allocation6]  }
   0xb   : > { %s2266_s18 = scalar_select %p1947_p4, 1, 0 }
   0xc   : > { %s2267_s19 = scalar_select %p1952_p6, 1, 0 }
   0xd   : > { %p1957_p8 = pnand %p1337_p5, %p119_p7  ;;  %s131_s22 = sshll.u32 %s1876_s21, 4  ;;  %s1961_s22 = int_to_ptr.vmem [resolvable:$true] %s131_s22 }
   0xe   : > { %s1877_s24 = smov [#allocation8]   ;;  %s1718_s28 = scalar_lea.hbm %s2260_s1, 512 }
   0xf   : > { %p1574_p9 = pneg %p1957_p8  ;;  %s144_s25 = sshll.u32 %s1877_s24, 4  ;;  %s1972_s25 = int_to_ptr.vmem [resolvable:$true] %s144_s25 }
  0x10   : > { %p1719_p12 = scmp.ne.s32.totalorder %s2260_s1, %s1718_s28  ;;  %p1725_p5 = scmp.lt.u32.totalorder %s1718_s28, %s2260_s1 }
  0x11   : > { %p1968_p11 = pnand %p1574_p9, %p2263_p1 }
  0x13   : > { %p1720_p13 = pneg %p1968_p11 }
  0x15   : > { %p1721_p0 = pnand %p1720_p13, %p1719_p12 }
  0x17   : > { %p1722_p3 = pneg %p1721_p0 }
  0x19   : > { %p1727_p7 = pnand %p1725_p5, %p1722_p3 }
  0x1b   : > { %1730 = shalt.err (!%p1727_p7)
}
  0x1c   : > { %s1731_s6 = scalar_lea.vmem %s1961_s22, 512  ;;  %p1739_p2 = scmp.lt.s32.totalorder %s1961_s22, %s1961_s22 }
  0x1d   : > { %p1732_p9 = scmp.ne.s32.totalorder %s1961_s22, %s1731_s6  ;;  %p1740_p12 = scmp.lt.s32.totalorder %s1731_s6, %s1731_s6 }
  0x1f   : > { %p1734_p10 = pnand %p1732_p9, %p1720_p13  ;;  %p1741_p0 = por %p1740_p12, %p1739_p2 }
  0x21   : > { %p1735_p1 = pneg %p1734_p10 }
  0x23   : > { %p1742_p6 = pnand %p1741_p0, %p1735_p1 }
  0x25   : > { %1745 = shalt.err (!%p1742_p6)
}
  0x26   : > { %s1878_s7 = smov 128   ;;  %s1879_s8 = smov 8  }
  0x27   : > { %1577 = dma.hbm_to_vmem [thread:$0]  (!%p1968_p11), %s2260_s1, 512, %s1961_s22, [#allocation7], %s1878_s7, %s1878_s7, %s1879_s8  }
  0x28   : > { %s1746_s21 = scalar_lea.hbm %s2261_s2, 512 }
  0x29   : > { %p1747_p1 = scmp.ne.s32.totalorder %s2261_s2, %s1746_s21  ;;  %p1753_p10 = scmp.lt.u32.totalorder %s1746_s21, %s2261_s2 }
  0x2b   : > { %p1749_p2 = pnand %p1747_p1, %p1720_p13 }
  0x2d   : > { %p1750_p6 = pneg %p1749_p2 }
  0x2f   : > { %p1755_p3 = pnand %p1753_p10, %p1750_p6 }
  0x31   : > { %1758 = shalt.err (!%p1755_p3)
}
  0x32   : > { %s1759_s22 = scalar_lea.vmem %s1972_s25, 512  ;;  %p1767_p12 = scmp.lt.s32.totalorder %s1972_s25, %s1972_s25 }
  0x33   : > { %p1760_p5 = scmp.ne.s32.totalorder %s1972_s25, %s1759_s22  ;;  %p1768_p0 = scmp.lt.s32.totalorder %s1759_s22, %s1759_s22 }
  0x35   : > { %p1762_p7 = pnand %p1760_p5, %p1720_p13  ;;  %p1769_p1 = por %p1768_p0, %p1767_p12 }
  0x37   : > { %p1763_p9 = pneg %p1762_p7 }
  0x39   : > { %p1770_p2 = pnand %p1769_p1, %p1763_p9 }
  0x3b   : > { %1773 = shalt.err (!%p1770_p2)
}
  0x3c   : > { %1580 = dma.hbm_to_vmem [thread:$0]  (!%p1968_p11), %s2261_s2, 512, %s1972_s25, [#allocation7], %s1878_s7, %s1878_s7, %s1879_s8  }
  0x3d   : > { %s2033_s23 = sadd.s32 1, %s1874_s15   ;;  %s27_s4 = sadd.s32 1, %s1870_s14 }
  0x3e   : > { %s24_s5 = ssub.s32 %s1874_s15, %s2033_s23  ;;  %p34_p13 = scmp.ne.s32.totalorder %s1870_s14, %s1866_s13 }
  0x3f   : > { %p25_p6 = scmp.eq.s32.totalorder %s24_s5, 0  ;;  %p35_p10 = scmp.eq.s32.totalorder %s1874_s15, 0 }
  0x40   : > { %p2270_p3 = scmp.eq.s32.totalorder %s1938_s16, 1  ;;  %p1591_p7 = scmp.lt.s32.totalorder %s1874_s15, 2 }
  0x41   : > { %s2049_s9 = scalar_select %p25_p6, %s1870_s14, %s27_s4  }
  0x42   : > { %p2043_p5 = por %p2270_p3, %p34_p13  ;;  %p36_p9 = por %p35_p10, %p34_p13 }
  0x43   : > { %s158_s10 = sand.u32 1, %s1870_s14   ;;  %s1382_s25 = sshll.u32 %s1874_s15, 8 }
  0x44   : > { %s2271_s6 = scalar_select %p2043_p5, 1, 0 }
  0x45   : > { %s1341_s11 = sshll.u32 %s158_s10, 4  ;;  %s2056_s24 = scalar_lea.hbm %s2259_s0, %s1382_s25 }
  0x46   : > { %s162_s26 = scalar_lea.vmem [#allocation3], %s1341_s11  ;;  %p2060_p11 = pnand %p1591_p7, %p36_p9 }
  0x47   : > { %s169_s27 = sshll.u32 %s162_s26, 4  ;;  %s2064_s22 = scalar_lea.sflag [#allocation4], %s158_s10  ;;  %s2058_s27 = int_to_ptr.vmem [resolvable:$true] %s169_s27 }
  0x48   : > { %s1774_s29 = scalar_lea.hbm %s2056_s24, 256  ;;  %p1776_p0 = pneg %p2060_p11 }
  0x49   : > { %p1775_p12 = scmp.ne.s32.totalorder %s2056_s24, %s1774_s29  ;;  %s1779_s5 = scalar_lea.hbm %s2259_s0, 512 }
  0x4a   : > { %p1780_p13 = scmp.lt.u32.totalorder %s2056_s24, %s2259_s0  ;;  %p1781_p6 = scmp.lt.u32.totalorder %s1779_s5, %s1774_s29 }
  0x4b   : > { %p1777_p1 = pnand %p1776_p0, %p1775_p12  ;;  %p1783_p3 = scmp.lt.u32.totalorder %s1774_s29, %s2056_s24 }
  0x4c   : > { %p1782_p10 = por %p1781_p6, %p1780_p13 }
  0x4d   : > { %p1778_p2 = pneg %p1777_p1 }
  0x4e   : > { %p1784_p7 = por %p1783_p3, %p1782_p10 }
  0x50   : > { %p1785_p9 = pnand %p1784_p7, %p1778_p2 }
  0x52   : > { %1788 = shalt.err (!%p1785_p9)
}
  0x53   : > { %s1789_s10 = scalar_lea.vmem %s2058_s27, 256  ;;  %s1880_s17 = smov [#allocation3]  }
  0x54   : > { %p1790_p12 = scmp.ne.s32.totalorder %s2058_s27, %s1789_s10  ;;  %s1794_s21 = sshll.u32 %s1880_s17, 4  ;;  %s1795_s21 = int_to_ptr.vmem [resolvable:$false] %s1794_s21 }
  0x55   : > { %s1796_s26 = scalar_lea.vmem %s1795_s21, 512  ;;  %p1797_p4 = scmp.lt.s32.totalorder %s2058_s27, %s1795_s21 }
  0x56   : > { %p1792_p1 = pnand %p1790_p12, %p1776_p0  ;;  %p1798_p13 = scmp.lt.s32.totalorder %s1796_s26, %s1789_s10 }
  0x58   : > { %p1793_p5 = pneg %p1792_p1  ;;  %p1799_p6 = por %p1798_p13, %p1797_p4 }
  0x5a   : > { %p1800_p10 = pnand %p1799_p6, %p1793_p5 }
  0x5c   : > { %1803 = shalt.err (!%p1800_p10)
}
  0x5d   : > { %1584 = dma.hbm_to_vmem [thread:$0]  (!%p2060_p11), %s2056_s24, 256, %s2058_s27, %s2064_s22, %s1878_s7, %s1878_s7, %s1879_s8  }
  0x5e   : > { %181 = sbr.rel (%p1957_p8) target bundleno = 3168 (0xc60), region = 32  ;;  %s2098_s29 = sand.u32 (!%p1957_p8), 1, %s1866_s13  }
  0x5f   : > { %s1345_s30 = sshll.u32 (!%p1957_p8), %s2098_s29, 4  ;;  %s184_s4 = scalar_lea.sflag (!%p1957_p8), [#allocation4], %s2098_s29 }
  0x60   : > { %s187_s28 = scalar_lea.vmem (!%p1957_p8), [#allocation3], %s1345_s30  ;;  %p2273_p4 = scmp.ne.s32.totalorder (!%p1957_p8), %s2266_s18, 0 }
  0x65   : > { %1849 = dma.done.wait (%p2273_p4), %s184_s4, 256  }
  0x66   : > { %1851 = vsyncadd (%p2273_p4), %s184_s4, 4294967040  ;;  %p2274_p5 = scmp.eq.s32.totalorder %s1938_s16, 0 }
  0x68   : > { %1853 = dma.done.wait (%p2274_p5), [#allocation7], 1024   ;;  %p2275_p8 = pmov %p2274_p5 }
  0x69   : > { %vm224_vm0 = vcmask 261120   ;;  %v220_v0 = vld [vmem:[#allocation6] sm:$0xff]  ;;  %v221_v1 = vld [vmem:[#allocation6 + $0x8] sm:$0xff]  ;;  %v222_v2 = vld [vmem:[#allocation6 + $0x10] sm:$0xff]  ;;  %vm312_vm1 = vcmask 64512   ;;  %s1881_s18 = smov 96  }
  0x6a   : > { %1855 = vsyncadd (%p2275_p8), [#allocation7], 4294966272  ;;  %v1506_v3 = vpack.c.bf16 %v221_v1, %v220_v0  ;;  %v223_v4 = vld [vmem:[#allocation6 + $0x18] sm:$0xff]  ;;  %v218_v5 = vld [vmem:[%s187_s28] sm:$0xff]  ;;  %vm396_vm3 = vcmask 130048   ;;  %s1882_s20 = smov 64  }
  0x6b   : > { %v1510_v6 = vpack.c.bf16 %v223_v4, %v222_v2  ;;  %1436 = vmatprep.mubr.msk.f32.mxu0 %vm224_vm0, %v218_v5  ;;  %v219_v7 = vld [vmem:[%s187_s28 + $0x8] sm:$0xff]  ;;  %vm2127_vm2 = vmpackc.low %vm312_vm1, %vm312_vm1  ;;  %s1883_s7 = smov 88   ;;  %s1884_s8 = smov 120   ;;  %vm716_vm4 = vcmask 130112   ;;  %vm927_vm5 = vcmask 195712   ;;  %vm1138_vm6 = vcmask 261312  }
  0x6c   : > { %1507 = vmatprep.subr.bf16.mxu0 %v1506_v3  ;;  %s1885_s24 = smov 56   ;;  %s1886_s27 = smov 80  }
  0x6d   : > { %1509 = vmatpush3.bf16.msra.mxu0 %v1506_v3  ;;  %s1887_s22 = smov 112   ;;  %s1888_s5 = smov 72  }
  0x6e   : > { %1511 = vmatprep.subr.bf16.mxu0 %v1510_v6  ;;  %s1889_s11 = smov 104   ;;  %s1890_s25 = smov 48  }
  0x6f   : > { %s1891_s10 = smov 8   ;;  %s1892_s17 = smov 40  }
  0x70   : > { %s1893_s21 = smov 16   ;;  %s1894_s26 = smov 24  }
  0x71   : > { %1513 = vmatpush3.bf16.msra.mxu0 %v1510_v6  ;;  %s217_s4 = scalar_lea.vmem [#allocation9], %s1345_s30  ;;  %p2278_p0 = scmp.ne.s32.totalorder %s2271_s6, 0 }
  0x72   : > { %s1244_s28 = sshll.u32 %s217_s4, 4  ;;  %s2207_s28 = int_to_ptr.vmem [resolvable:$true] %s1244_s28 }
  0x73   : > { %s1804_s30 = scalar_lea.vmem %s2207_s28, 256 }
  0x74   : > { %1437 = vmatmul.mubr.msk.f32.vlgmr.msra.gmra.mrb[0].mxu0 %vm224_vm0, %v219_v7  ;;  %p1805_p11 = scmp.ne.s32.totalorder %s2207_s28, %s1804_s30 }
  0x76   : > { %p1806_p2 = pnand %p1805_p11, %p2278_p0 }
  0x78   : > { %p1807_p3 = pneg %p1806_p2 }
 0x147   : > { %v2114_v8 = vpop.f32.mrb[0].mxu0 }
 0x148   : > { %v2116_v9 = vpop.f32.mrb[1].mxu0 }
 0x149   : > { %1443 = vmatprep.mubr.msk.f32.mxu1 %vm312_vm1, %v2116_v9  ;;  %v2122_v10 = vpack.i.bf16 %v2114_v8, %v2116_v9 }
 0x14b   : > { %1647 = vrot.lane.b32.xlu0 %v2122_v10, %s1881_s18  ;;  %s1383_s18 = sshll.u32 %s1938_s16, 8  ;;  %s1895_s16 = smov [#allocation9]  }
 0x1bd   : > { %v1648_v11 = vpop.permute.xlu0 %1647 }
 0x1be   : > { %v1650_v12 = vunpack.i.h.bf16 %v1648_v11  ;;  %v1649_v13 = vunpack.i.l.bf16 %v1648_v11 }
 0x1c0   : > { %v1514_v15 = vpack.c.bf16 %v1650_v12, %v1649_v13 }
 0x1c2   : > { %1516 = vmatprep.subr.msk.bf16.mxu1 %vm2127_vm2, %v1514_v15 }
 0x1c3   : > { %1519 = vmatpush3.bf16.xpose.msk.msra.mxu1 %vm2127_vm2, %v1514_v15 }
 0x1ca   : > { %1444 = vmatmul.mubr.msk.f32.vlgmr.msra.gmra.mrb[0].mxu1 %vm312_vm1, %v2114_v8 }
 0x29d   : > { %v1445_v16 = vpop.f32.mrb[0].mxu1 }
 0x29e   : > { %v387_v17 = vpop.f32.mrb[1].mxu1  ;;  %v400_v18 = vsel %vm396_vm3, %v1445_v16, -inf }
 0x29f   : > { %401 = vmax.xlane.f32.xlu1 %v400_v18  ;;  %v397_v19 = vsel %vm396_vm3, %v387_v17, -inf }
 0x2a0   : > { %398 = vmax.xlane.f32.xlu0 %v397_v19 }
 0x2b0   : > { %1652 = vrot.lane.b32.xlu1 %v2122_v10, %s1882_s20 }
 0x2b4   : > { %1657 = vrot.lane.b32.xlu1 %v2122_v10, %s1883_s7 }
 0x2b6   : > { %510 = vrot.lane.b32.xlu0 %v2114_v8, %s1884_s8 }
 0x32c   : > { %v402_v20 = vpop.xlane.xlu1 %401 }
 0x32d   : > { %v404_v21 = vsub.f32 %v1445_v16, %v402_v20  ;;  %v399_v22 = vpop.xlane.xlu0 %398 }
 0x32e   : > { %v403_v23 = vsub.f32 %v387_v17, %v399_v22 }
 0x32f   : > { %v407_v24 = vmul.f32 1.442695, %v404_v21 }
 0x330   : > { %v405_v25 = vmul.f32 1.442695, %v403_v23  ;;  %v1653_v26 = vpop.permute.xlu1 %1652 }
 0x331   : > { %1686 = vpow2.f32 %v407_v24  ;;  %v1655_v27 = vunpack.i.h.bf16 %v1653_v26  ;;  %v1654_v28 = vunpack.i.l.bf16 %v1653_v26  ;;  %v511_v45 = vpop.permute.xlu0 %510 }
 0x332   : > { %1688 = vpow2.f32 %v405_v25 }
 0x333   : > { %v1520_v29 = vpack.c.bf16 %v1655_v27, %v1654_v28 }
 0x334   : > { %v1658_v30 = vpop.permute.xlu1 %1657 }
 0x335   : > { %v1660_v31 = vunpack.i.h.bf16 %v1658_v30  ;;  %v1659_v32 = vunpack.i.l.bf16 %v1658_v30  ;;  %1521 = vmatprep.subr.bf16.mxu1 %v1520_v29 }
 0x336   : > { %1523 = vmatpush3.bf16.msra.mxu1 %v1520_v29 }
 0x337   : > { %v1524_v33 = vpack.c.bf16 %v1660_v31, %v1659_v32 }
 0x339   : > { %1526 = vmatprep.subr.msk.bf16.mxu1 %vm2127_vm2, %v1524_v33 }
 0x33b   : > { %v1687_v34 = vpop.eup %1686 }
 0x33c   : > { %v412_v35 = vsel %vm396_vm3, %v1687_v34, 0.0  ;;  %v1689_v36 = vpop.eup %1688 }
 0x33d   : > { %413 = vadd.xlane.f32.xlu1 %v412_v35  ;;  %v409_v37 = vsel %vm396_vm3, %v1689_v36, 0.0 }
 0x341   : > { %410 = vadd.xlane.f32.xlu1 %v409_v37 }
 0x352   : > { %508 = vrot.lane.b32.xlu1 %v2116_v9, %s1884_s8  ;;  %s2212_s8 = scalar_lea.hbm %s2262_s3, %s1383_s18 }
 0x3ca   : > { %v414_v38 = vpop.xlane.xlu1 %413 }
 0x3cb   : > { %1690 = vrcp.f32 %v414_v38 }
 0x3ce   : > { %v411_v39 = vpop.xlane.xlu1 %410 }
 0x3cf   : > { %1692 = vrcp.f32 %v411_v39 }
 0x3d2   : > { %v509_v44 = vpop.permute.xlu1 %508 }
 0x3d5   : > { %v1691_v40 = vpop.eup %1690 }
 0x3d6   : > { %v418_v43 = vmul.f32 %v1691_v40, %v1687_v34 }
 0x3d9   : > { %v1693_v41 = vpop.eup %1692 }
 0x3da   : > { %v417_v42 = vmul.f32 %v1693_v41, %v1689_v36 }
 0x3dc   : > { %1450 = vmatprep.mubr.msk.f32.mxu1 %vm396_vm3, %v417_v42 }
 0x3dd   : > { %1451 = vmatmul.mubr.msk.f32.vlgmr.msra.gmra.mrb[2].mxu1 %vm396_vm3, %v418_v43 }
 0x3de   : > { %1529 = vmatpush3.bf16.xpose.msk.msra.mxu1 %vm2127_vm2, %v1524_v33  ;;  %1457 = vmatprep.mubr.msk.f32.mxu1 %vm312_vm1, %v509_v44 }
 0x3e5   : > { %1458 = vmatmul.mubr.msk.f32.vlgmr.msra.gmra.mrb[4].mxu1 %vm312_vm1, %v511_v45 }
 0x4b0   : > { %v1452_v46 = vpop.f32.mrb[2].mxu1 }
 0x4b1   : > { %507 = vst.msk [vmem:[#allocation2 + $0x8] sm:$0xff] %vm312_vm1, %v1452_v46  ;;  %v497_v47 = vpop.f32.mrb[3].mxu1 }
 0x4b2   : > { %506 = vst.msk [vmem:[#allocation2] sm:$0xff] %vm312_vm1, %v497_v47 }
 0x4b8   : > { %v1459_v48 = vpop.f32.mrb[4].mxu1 }
 0x4b9   : > { %v590_v49 = vpop.f32.mrb[5].mxu1  ;;  %v602_v50 = vsel %vm396_vm3, %v1459_v48, -inf }
 0x4ba   : > { %603 = vmax.xlane.f32.xlu0 %v602_v50  ;;  %v599_v51 = vsel %vm396_vm3, %v590_v49, -inf }
 0x4bb   : > { %600 = vmax.xlane.f32.xlu1 %v599_v51 }
 0x4cc   : > { %1662 = vrot.lane.b32.xlu1 %v2122_v10, %s1885_s24  ;;  %s1231_s24 = scalar_lea.sflag [#allocation5], %s2098_s29 }
 0x4d0   : > { %1667 = vrot.lane.b32.xlu0 %v2122_v10, %s1886_s27  ;;  %719 = vrot.lane.b32.xlu1 %v2116_v9, %s1887_s22  ;;  %s1808_s27 = sshll.u32 %s1895_s16, 4  ;;  %s1809_s27 = int_to_ptr.vmem [resolvable:$false] %s1808_s27 }
 0x4d1   : > { %p1811_p7 = scmp.lt.s32.totalorder %s2207_s28, %s1809_s27 }
 0x547   : > { %v604_v52 = vpop.xlane.xlu0 %603 }
 0x548   : > { %v606_v53 = vsub.f32 %v1459_v48, %v604_v52  ;;  %v601_v54 = vpop.xlane.xlu1 %600 }
 0x549   : > { %v605_v55 = vsub.f32 %v590_v49, %v601_v54 }
 0x54a   : > { %v609_v56 = vmul.f32 1.442695, %v606_v53 }
 0x54b   : > { %v607_v57 = vmul.f32 1.442695, %v605_v55  ;;  %v1668_v58 = vpop.permute.xlu0 %1667 }
 0x54c   : > { %1694 = vpow2.f32 %v609_v56  ;;  %v1663_v59 = vpop.permute.xlu1 %1662  ;;  %v1670_v60 = vunpack.i.h.bf16 %v1668_v58  ;;  %v1669_v61 = vunpack.i.l.bf16 %v1668_v58 }
 0x54d   : > { %v1665_v62 = vunpack.i.h.bf16 %v1663_v59  ;;  %v1664_v63 = vunpack.i.l.bf16 %v1663_v59  ;;  %1696 = vpow2.f32 %v607_v57 }
 0x54e   : > { %v1534_v1 = vpack.c.bf16 %v1670_v60, %v1669_v61 }
 0x54f   : > { %v1530_v0 = vpack.c.bf16 %v1665_v62, %v1664_v63 }
 0x550   : > { %v720_v6 = vpop.permute.xlu1 %719 }
 0x551   : > { %1531 = vmatprep.subr.bf16.mxu0 %v1530_v0 }
 0x552   : > { %1533 = vmatpush3.bf16.msra.mxu0 %v1530_v0 }
 0x553   : > { %1536 = vmatprep.subr.msk.bf16.mxu0 %vm2127_vm2, %v1534_v1 }
 0x556   : > { %v1695_v2 = vpop.eup %1694 }
 0x557   : > { %v614_v3 = vsel %vm396_vm3, %v1695_v2, 0.0  ;;  %v1697_v4 = vpop.eup %1696 }
 0x558   : > { %615 = vadd.xlane.f32.xlu1 %v614_v3  ;;  %v611_v5 = vsel %vm396_vm3, %v1697_v4, 0.0 }
 0x55c   : > { %612 = vadd.xlane.f32.xlu1 %v611_v5 }
 0x56d   : > { %721 = vrot.lane.b32.xlu1 %v2114_v8, %s1887_s22  ;;  %s1810_s22 = scalar_lea.vmem %s1809_s27, 512 }
 0x56e   : > { %p1812_p9 = scmp.lt.s32.totalorder %s1810_s22, %s1804_s30 }
 0x570   : > { %p1813_p12 = por %p1812_p9, %p1811_p7 }
 0x572   : > { %p1814_p1 = pnand %p1813_p12, %p1807_p3 }
 0x5e5   : > { %v616_v7 = vpop.xlane.xlu1 %615 }
 0x5e6   : > { %1698 = vrcp.f32 %v616_v7 }
 0x5e9   : > { %v613_v11 = vpop.xlane.xlu1 %612 }
 0x5ea   : > { %1700 = vrcp.f32 %v613_v11 }
 0x5ed   : > { %v722_v17 = vpop.permute.xlu1 %721 }
 0x5f0   : > { %v1699_v12 = vpop.eup %1698 }
 0x5f1   : > { %v620_v16 = vmul.f32 %v1699_v12, %v1695_v2 }
 0x5f4   : > { %v1701_v13 = vpop.eup %1700 }
 0x5f5   : > { %v619_v15 = vmul.f32 %v1701_v13, %v1697_v4 }
 0x5f7   : > { %1464 = vmatprep.mubr.msk.f32.mxu0 %vm396_vm3, %v619_v15 }
 0x5f8   : > { %1465 = vmatmul.mubr.msk.f32.vlgmr.msra.gmra.mrb[2].mxu0 %vm396_vm3, %v620_v16  ;;  %v1143_v16 = vld [vmem:[#allocation8] sm:$0xff] }
 0x5f9   : > { %1539 = vmatpush3.bf16.xpose.msk.msra.mxu0 %vm2127_vm2, %v1534_v1  ;;  %1471 = vmatprep.mubr.msk.f32.mxu0 %vm312_vm1, %v720_v6 }
 0x600   : > { %1472 = vmatmul.mubr.msk.f32.vlgmr.msra.gmra.mrb[4].mxu0 %vm312_vm1, %v722_v17  ;;  %v1144_v17 = vld [vmem:[#allocation8 + $0x8] sm:$0xff] }
 0x6cb   : > { %v2171_v18 = vpop.f32.mrb[2].mxu0 }
 0x6cc   : > { %v2173_v19 = vpop.f32.mrb[3].mxu0 }
 0x6d3   : > { %v1473_v20 = vpop.f32.mrb[4].mxu0 }
 0x6d4   : > { %v801_v21 = vpop.f32.mrb[5].mxu0  ;;  %v813_v22 = vsel %vm396_vm3, %v1473_v20, -inf }
 0x6d5   : > { %814 = vmax.xlane.f32.xlu0 %v813_v22  ;;  %v810_v23 = vsel %vm396_vm3, %v801_v21, -inf }
 0x6d6   : > { %811 = vmax.xlane.f32.xlu1 %v810_v23 }
 0x762   : > { %v815_v24 = vpop.xlane.xlu0 %814 }
 0x763   : > { %v817_v25 = vsub.f32 %v1473_v20, %v815_v24  ;;  %v812_v26 = vpop.xlane.xlu1 %811  ;;  %v1146_v20 = vld [vmem:[#allocation8 + $0x18] sm:$0xff] }
 0x764   : > { %v816_v27 = vsub.f32 %v801_v21, %v812_v26 }
 0x765   : > { %v820_v28 = vmul.f32 1.442695, %v817_v25 }
 0x766   : > { %v818_v29 = vmul.f32 1.442695, %v816_v27 }
 0x767   : > { %1702 = vpow2.f32 %v820_v28 }
 0x768   : > { %1704 = vpow2.f32 %v818_v29 }
 0x771   : > { %v1703_v30 = vpop.eup %1702 }
 0x772   : > { %v1705_v31 = vpop.eup %1704  ;;  %v825_v32 = vsel %vm396_vm3, %v1703_v30, 0.0 }
 0x773   : > { %826 = vadd.xlane.f32.xlu1 %v825_v32  ;;  %v822_v33 = vsel %vm396_vm3, %v1705_v31, 0.0 }
 0x774   : > { %823 = vadd.xlane.f32.xlu0 %v822_v33 }
 0x784   : > { %1677 = vrot.lane.b32.xlu1 %v2122_v10, %s1888_s5 }
 0x788   : > { %930 = vrot.lane.b32.xlu1 %v2116_v9, %s1889_s11 }
 0x78a   : > { %1672 = vrot.lane.b32.xlu0 %v2122_v10, %s1890_s25 }
 0x78e   : > { %932 = vrot.lane.b32.xlu0 %v2114_v8, %s1889_s11 }
 0x800   : > { %v827_v34 = vpop.xlane.xlu1 %826 }
 0x801   : > { %1706 = vrcp.f32 %v827_v34  ;;  %v824_v35 = vpop.xlane.xlu0 %823 }
 0x802   : > { %1708 = vrcp.f32 %v824_v35 }
 0x804   : > { %v1678_v36 = vpop.permute.xlu1 %1677 }
 0x805   : > { %v1673_v37 = vpop.permute.xlu0 %1672  ;;  %v1680_v38 = vunpack.i.h.bf16 %v1678_v36  ;;  %v1679_v39 = vunpack.i.l.bf16 %v1678_v36 }
 0x806   : > { %v1675_v40 = vunpack.i.h.bf16 %v1673_v37  ;;  %v1674_v41 = vunpack.i.l.bf16 %v1673_v37 }
 0x807   : > { %v1544_v43 = vpack.c.bf16 %v1680_v38, %v1679_v39 }
 0x808   : > { %v1540_v42 = vpack.c.bf16 %v1675_v40, %v1674_v41  ;;  %v931_v46 = vpop.permute.xlu1 %930 }
 0x809   : > { %v933_v47 = vpop.permute.xlu0 %932 }
 0x80a   : > { %1541 = vmatprep.subr.bf16.mxu1 %v1540_v42 }
 0x80b   : > { %v1707_v44 = vpop.eup %1706  ;;  %1543 = vmatpush3.bf16.msra.mxu1 %v1540_v42 }
 0x80c   : > { %v1709_v9 = vpop.eup %1708  ;;  %1546 = vmatprep.subr.msk.bf16.mxu1 %vm2127_vm2, %v1544_v43  ;;  %v831_v45 = vmul.f32 %v1707_v44, %v1703_v30 }
 0x80d   : > { %v830_v8 = vmul.f32 %v1709_v9, %v1705_v31 }
 0x80f   : > { %1478 = vmatprep.mubr.msk.f32.mxu1 %vm396_vm3, %v830_v8 }
 0x810   : > { %1479 = vmatmul.mubr.msk.f32.vlgmr.msra.gmra.mrb[6].mxu1 %vm396_vm3, %v831_v45 }
 0x811   : > { %1485 = vmatprep.mubr.msk.f32.mxu1 %vm312_vm1, %v931_v46 }
 0x814   : > { %1549 = vmatpush3.bf16.xpose.msk.msra.mxu1 %vm2127_vm2, %v1544_v43 }
 0x81b   : > { %1486 = vmatmul.mubr.msk.f32.vlgmr.msra.gmra.mrb[8].mxu1 %vm312_vm1, %v933_v47 }
 0x8e3   : > { %v1480_v48 = vpop.f32.mrb[6].mxu1 }
 0x8e4   : > { %v910_v49 = vpop.f32.mrb[7].mxu1 }
 0x8ee   : > { %v1487_v50 = vpop.f32.mrb[8].mxu1 }
 0x8ef   : > { %v1012_v51 = vpop.f32.mrb[9].mxu1  ;;  %v1024_v52 = vsel %vm396_vm3, %v1487_v50, -inf }
 0x8f0   : > { %1025 = vmax.xlane.f32.xlu0 %v1024_v52  ;;  %v1021_v53 = vsel %vm396_vm3, %v1012_v51, -inf }
 0x8f1   : > { %1022 = vmax.xlane.f32.xlu1 %v1021_v53 }
 0x97d   : > { %v1026_v54 = vpop.xlane.xlu0 %1025 }
 0x97e   : > { %v1028_v55 = vsub.f32 %v1487_v50, %v1026_v54  ;;  %v1023_v56 = vpop.xlane.xlu1 %1022 }
 0x97f   : > { %v1027_v57 = vsub.f32 %v1012_v51, %v1023_v56 }
 0x980   : > { %v1031_v58 = vmul.f32 1.442695, %v1028_v55 }
 0x981   : > { %v1029_v14 = vmul.f32 1.442695, %v1027_v57 }
 0x982   : > { %1710 = vpow2.f32 %v1031_v58 }
 0x983   : > { %1712 = vpow2.f32 %v1029_v14 }
 0x98c   : > { %v1711_v59 = vpop.eup %1710 }
 0x98d   : > { %v1713_v60 = vpop.eup %1712  ;;  %v1036_v61 = vsel %vm396_vm3, %v1711_v59, 0.0 }
 0x98e   : > { %1037 = vadd.xlane.f32.xlu1 %v1036_v61  ;;  %v1033_v62 = vsel %vm396_vm3, %v1713_v60, 0.0 }
 0x98f   : > { %1034 = vadd.xlane.f32.xlu0 %v1033_v62 }
 0x99f   : > { %710 = vrot.lane.b32.xlu1 %v2173_v19, %s1891_s10  ;;  %v1145_v19 = vld [vmem:[#allocation8 + $0x10] sm:$0xff] }
 0x9a0   : > { %v1558_v21 = vpack.c.bf16 %v1146_v20, %v1145_v19 }
 0x9a3   : > { %712 = vrot.lane.b32.xlu1 %v2171_v18, %s1891_s10  ;;  %v1554_v18 = vpack.c.bf16 %v1144_v17, %v1143_v16 }
 0x9a5   : > { %1682 = vrot.lane.b32.xlu0 %v2122_v10, %s1892_s17 }
 0x9a7   : > { %923 = vrot.lane.b32.xlu1 %v1480_v48, %s1893_s21 }
 0x9a9   : > { %921 = vrot.lane.b32.xlu0 %v910_v49, %s1893_s21 }
 0xa1b   : > { %v1038_v63 = vpop.xlane.xlu1 %1037 }
 0xa1c   : > { %1714 = vrcp.f32 %v1038_v63  ;;  %v1035_v0 = vpop.xlane.xlu0 %1034 }
 0xa1d   : > { %1716 = vrcp.f32 %v1035_v0 }
 0xa1f   : > { %v711_v1 = vpop.permute.xlu1 %710 }
 0xa20   : > { %717 = vst.msk [vmem:[#allocation2] sm:$0xff] %vm716_vm4, %v711_v1  ;;  %v1683_v2 = vpop.permute.xlu0 %1682 }
 0xa21   : > { %v1685_v3 = vunpack.i.h.bf16 %v1683_v2  ;;  %v1684_v4 = vunpack.i.l.bf16 %v1683_v2 }
 0xa23   : > { %v1550_v5 = vpack.c.bf16 %v1685_v3, %v1684_v4  ;;  %v713_v6 = vpop.permute.xlu1 %712 }
 0xa24   : > { %718 = vst.msk [vmem:[#allocation2 + $0x8] sm:$0xff] %vm716_vm4, %v713_v6  ;;  %v922_v7 = vpop.permute.xlu0 %921 }
 0xa25   : > { %928 = vst.msk [vmem:[#allocation2] sm:$0xff] %vm927_vm5, %v922_v7  ;;  %1551 = vmatprep.subr.bf16.mxu0 %v1550_v5 }
 0xa26   : > { %v1715_v10 = vpop.eup %1714  ;;  %1553 = vmatpush3.bf16.msra.mxu0 %v1550_v5 }
 0xa27   : > { %v1717_v11 = vpop.eup %1716  ;;  %v924_v12 = vpop.permute.xlu1 %923  ;;  %v1042_v15 = vmul.f32 %v1715_v10, %v1711_v59  ;;  %1555 = vmatprep.subr.bf16.mxu0 %v1554_v18 }
 0xa28   : > { %929 = vst.msk [vmem:[#allocation2 + $0x8] sm:$0xff] %vm927_vm5, %v924_v12  ;;  %v1041_v13 = vmul.f32 %v1717_v11, %v1713_v60 }
 0xa2a   : > { %1492 = vmatprep.mubr.msk.f32.mxu0 %vm396_vm3, %v1041_v13 }
 0xa2b   : > { %1493 = vmatmul.mubr.msk.f32.vlgmr.msra.gmra.mrb[6].mxu0 %vm396_vm3, %v1042_v15 }
 0xa2c   : > { %1557 = vmatpush3.bf16.msra.mxu0 %v1554_v18 }
 0xa2d   : > { %1559 = vmatprep.subr.bf16.mxu0 %v1558_v21 }
 0xa30   : > { %1561 = vmatpush3.bf16.msra.mxu0 %v1558_v21 }
 0xafe   : > { %v1494_v22 = vpop.f32.mrb[6].mxu0 }
 0xaff   : > { %1134 = vrot.lane.b32.xlu1 %v1494_v22, %s1894_s26  ;;  %v1121_v23 = vpop.f32.mrb[7].mxu0 }
 0xb00   : > { %1132 = vrot.lane.b32.xlu0 %v1121_v23, %s1894_s26 }
 0xb71   : > { %v1135_v24 = vpop.permute.xlu1 %1134 }
 0xb72   : > { %1140 = vst.msk [vmem:[#allocation2 + $0x8] sm:$0xff] %vm1138_vm6, %v1135_v24  ;;  %v1133_v25 = vpop.permute.xlu0 %1132 }
 0xb73   : > { %1139 = vst.msk [vmem:[#allocation2] sm:$0xff] %vm1138_vm6, %v1133_v25 }
 0xb79   : > { %v1142_v27 = vld [vmem:[#allocation2 + $0x8] sm:$0xff] }
 0xb7a   : > { %v1141_v26 = vld [vmem:[#allocation2] sm:$0xff] }
 0xb7b   : > { %1503 = vmatprep.mubr.msk.f32.mxu0 %vm224_vm0, %v1141_v26 }
 0xb7c   : > { %1504 = vmatmul.mubr.msk.f32.vlgmr.msra.gmra.mrb[8].mxu0 %vm224_vm0, %v1142_v27 }
 0xc4f   : > { %v1505_v28 = vpop.f32.mrb[8].mxu0 }
 0xc50   : > { %1229 = vst.msk [vmem:[%s217_s4 + $0x8] sm:$0xff] %vm224_vm0, %v1505_v28  ;;  %v1219_v29 = vpop.f32.mrb[9].mxu0 }
 0xc51   : > { %1228 = vst.msk [vmem:[%s217_s4] sm:$0xff] %vm224_vm0, %v1219_v29 }
 0xc52   : > { %1817 = shalt.err (!%p1814_p1)
}
 0xc53   : > { %s1818_s5 = scalar_lea.hbm %s2212_s8, 256  ;;  %s1822_s17 = scalar_lea.hbm %s2262_s3, 512 }
 0xc54   : > { %p1819_p13 = scmp.ne.s32.totalorder %s2212_s8, %s1818_s5  ;;  %p1823_p4 = scmp.lt.u32.totalorder %s2212_s8, %s2262_s3 }
 0xc55   : > { %p1824_p5 = scmp.lt.u32.totalorder %s1822_s17, %s1818_s5  ;;  %p1826_p11 = scmp.lt.u32.totalorder %s1818_s5, %s2212_s8 }
 0xc56   : > { %p1820_p6 = pnand %p1819_p13, %p2278_p0 }
 0xc57   : > { %p1825_p8 = por %p1824_p5, %p1823_p4 }
 0xc58   : > { %p1821_p10 = pneg %p1820_p6 }
 0xc59   : > { %p1827_p2 = por %p1826_p11, %p1825_p8 }
 0xc5b   : > { %p1828_p3 = pnand %p1827_p2, %p1821_p10 }
 0xc5d   : > { %1831 = shalt.err (!%p1828_p3)
}
 0xc5e   : > { %s1896_s4 = smov 128  }
 0xc5f   : > { %1572 = dma.vmem_to_hbm [thread:$0]  (%p2278_p0), %s2207_s28, 256, %s2212_s8, %s1231_s24, %s1896_s4, %s1896_s4, %s1891_s10  }
 0xc60 PF: > { %s1259_s18 = sand.u32 1, %s1862_s12   ;;  %p2279_p7 = scmp.ne.s32.totalorder %s2267_s19, 0 }
 0xc61   : > { %p2280_p9 = scmp.ge.s32.totalorder %s1874_s15, 2  ;;  %s1260_s20 = scalar_lea.sflag [#allocation5], %s1259_s18 }
 0xc63   : > { %p1586_p12 = pnand %p2280_p9, %p2279_p7 }
 0xc65   : > { %1857 = dma.done.wait (!%p1586_p12), %s1260_s20, 256  }
 0xc66   : > { %1859 = vsyncadd (!%p1586_p12), %s1260_s20, 4294967040  ;;  %p17_p1 = scmp.ge.s32.totalorder %s2033_s23, 4   ;;  %s2281_s12 = smov %s1866_s13 }
 0xc67   : > { %s2282_s13 = smov %s1870_s14  ;;  %s2283_s14 = smov %s2049_s9 }
 0xc68   : > { %s2284_s15 = smov %s2033_s23  ;;  %19 = sbr.rel (!%p17_p1) target bundleno = 6 (0x6), region = 85 }
 0xc6f   :  { %1265 = vsyncpa [#allocation4], 1 }
 0xc70   :  { %1267 = vsyncpa [#allocation4 + $0x1], 1 }
 0xc71   :  { %1268 = vsyncpa [#allocation7], 1 }
 0xc72   :  { %1269 = vsyncpa [#allocation5], 1 }
 0xc73   :  { %1271 = vsyncpa [#allocation5 + $0x1], 1 }

</bundles_post_ra>
